<compile_context>
chip_gen: v7x
topology: tpu7x:2x2x1
jax: 0.10.0
libtpu: 0.0.40
codegen_flags: <defaults>
</compile_context>

<pallas_src>
import jax
import jax.numpy as jnp
from jax.experimental import pallas as pl
from jax.experimental.pallas import tpu as pltpu


def autoencoder_kernel(x_ref,
                       w1_ref, b1_ref,
                       w2_ref, b2_ref,
                       w3_ref, b3_ref,
                       w4_ref, b4_ref,
                       o_ref):
    """One batch tile, all four layers fused, feature-major / batch-lane layout."""
    cdt = w1_ref.dtype
    a = x_ref[...].astype(cdt)                                         # (in, TB)

    # encoder layer 1: Linear + ReLU
    h1 = jnp.dot(w1_ref[...], a, preferred_element_type=jnp.float32) + b1_ref[...]
    h1 = jnp.maximum(h1, 0.0).astype(cdt)                              # (hidden, TB)

    # encoder layer 2: Linear + ReLU  (latent)
    z = jnp.dot(w2_ref[...], h1, preferred_element_type=jnp.float32) + b2_ref[...]
    z = jnp.maximum(z, 0.0).astype(cdt)                                # (latent, TB)

    # decoder layer 1: Linear + ReLU
    h2 = jnp.dot(w3_ref[...], z, preferred_element_type=jnp.float32) + b3_ref[...]
    h2 = jnp.maximum(h2, 0.0).astype(cdt)                              # (hidden, TB)

    # decoder layer 2: Linear (no activation)
    y = jnp.dot(w4_ref[...], h2, preferred_element_type=jnp.float32) + b4_ref[...]
    o_ref[...] = y.astype(o_ref.dtype)                                 # (in, TB)


def prepare_params(params, compute_dtype=jnp.float32):
    """One-time glue (call outside the hot loop).

    Weights keep PyTorch (out, in) layout, cast once to the matmul operand
    dtype (f32, or bf16 on v6e/v7x). Biases become f32 columns (out, 1) so
    they broadcast along the lane (batch) axis inside the kernel.
    """
    return dict(
        w1=params["enc1_w"].astype(compute_dtype),
        b1=params["enc1_b"].reshape(-1, 1).astype(jnp.float32),
        w2=params["enc2_w"].astype(compute_dtype),
        b2=params["enc2_b"].reshape(-1, 1).astype(jnp.float32),
        w3=params["dec1_w"].astype(compute_dtype),
        b3=params["dec1_b"].reshape(-1, 1).astype(jnp.float32),
        w4=params["dec2_w"].astype(compute_dtype),
        b4=params["dec2_b"].reshape(-1, 1).astype(jnp.float32),
    )


@jax.jit
def autoencoder_forward(x, prepared):
    """x: (B, input_size).  prepared: output of prepare_params()."""
    B, input_size = x.shape
    w1, b1 = prepared["w1"], prepared["b1"]
    w2, b2 = prepared["w2"], prepared["b2"]
    w3, b3 = prepared["w3"], prepared["b3"]
    w4, b4 = prepared["w4"], prepared["b4"]
    hidden_size, latent_size = int(w1.shape[0]), int(w2.shape[0])

    # Batch tile: a single full-extent tile for small batches; 256-row tiles
    # (>= 2x MXU rows on v6e/v7x, 2x128 passes on v5e) with pipelined x/out
    # DMAs once the batch is large.  Weights stay resident either way.
    TB = 256 if B > 256 else B
    n_tiles = pl.cdiv(B, TB)
    Bp = n_tiles * TB

    x_t = x.T                                                   # (in, B), lane = batch
    if Bp != B:
        x_t = jnp.pad(x_t, ((0, 0), (0, Bp - B)))

    def full_block(arr):  # grid-invariant, VMEM-resident across all batch tiles
        return pl.BlockSpec(arr.shape, lambda i: (0, 0))

    flops = 2 * Bp * (input_size * hidden_size + hidden_size * latent_size
                      + latent_size * hidden_size + hidden_size * input_size)
    bytes_accessed = (
        Bp * input_size * x.dtype.itemsize            # x in
        + Bp * input_size * x.dtype.itemsize          # out
        + sum(int(p.size) * p.dtype.itemsize
              for p in (w1, b1, w2, b2, w3, b3, w4, b4))
    )

    out_t = pl.pallas_call(
        autoencoder_kernel,
        out_shape=jax.ShapeDtypeStruct((input_size, Bp), x.dtype),
        grid=(n_tiles,),
        in_specs=[
            pl.BlockSpec((input_size, TB), lambda i: (0, i)),   # x tile
            full_block(w1), full_block(b1),
            full_block(w2), full_block(b2),
            full_block(w3), full_block(b3),
            full_block(w4), full_block(b4),
        ],
        out_specs=pl.BlockSpec((input_size, TB), lambda i: (0, i)),
        compiler_params=pltpu.CompilerParams(
            dimension_semantics=("parallel",)),
        cost_estimate=pl.CostEstimate(flops=flops, transcendentals=0,
                                      bytes_accessed=bytes_accessed),
    )(x_t, w1, b1, w2, b2, w3, b3, w4, b4)

    return out_t[:, :B].T                                       # back to (B, in)


def init_params(key, input_size, hidden_size, latent_size):
    """Deterministic init mimicking nn.Linear's uniform(-1/sqrt(fan_in), ...)."""
    def linear(k, fan_in, fan_out):
        kw, kb = jax.random.split(k)
        bound = 1.0 / jnp.sqrt(jnp.float32(fan_in))
        w = jax.random.uniform(kw, (fan_out, fan_in), jnp.float32, -bound, bound)
        b = jax.random.uniform(kb, (fan_out,), jnp.float32, -bound, bound)
        return w, b

    k1, k2, k3, k4 = jax.random.split(key, 4)
    enc1_w, enc1_b = linear(k1, input_size, hidden_size)
    enc2_w, enc2_b = linear(k2, hidden_size, latent_size)
    dec1_w, dec1_b = linear(k3, latent_size, hidden_size)
    dec2_w, dec2_b = linear(k4, hidden_size, input_size)
    return dict(enc1_w=enc1_w, enc1_b=enc1_b,
                enc2_w=enc2_w, enc2_b=enc2_b,
                dec1_w=dec1_w, dec1_b=dec1_b,
                dec2_w=dec2_w, dec2_b=dec2_b)


def reference_forward(x, p):
    """Pure-JAX reference matching the PyTorch semantics."""
    h = jnp.maximum(x @ p["enc1_w"].T + p["enc1_b"], 0.0)
    z = jnp.maximum(h @ p["enc2_w"].T + p["enc2_b"], 0.0)
    h2 = jnp.maximum(z @ p["dec1_w"].T + p["dec1_b"], 0.0)
    return h2 @ p["dec2_w"].T + p["dec2_b"]


if __name__ == "__main__":
    input_size, hidden_size, latent_size = 16, 32, 8
    batch = 8

    key = jax.random.PRNGKey(0)
    kx, kp = jax.random.split(key)
    x = jax.random.normal(kx, (batch, input_size), jnp.float32)
    params = init_params(kp, input_size, hidden_size, latent_size)
    ref = reference_forward(x, params)

    # f32 path (exact-semantics match with the PyTorch module).
    prepared_f32 = prepare_params(params, compute_dtype=jnp.float32)
    out = jax.block_until_ready(autoencoder_forward(x, prepared_f32))
    assert out.shape == (batch, input_size)
    assert jnp.allclose(out, ref, atol=1e-5, rtol=1e-5), "f32 mismatch vs reference"

    # bf16-operand path (v6e/v7x MXU optimization; f32 accumulation + f32 bias/ReLU).
    prepared_bf16 = prepare_params(params, compute_dtype=jnp.bfloat16)
    out_bf16 = jax.block_until_ready(autoencoder_forward(x, prepared_bf16))
    assert jnp.allclose(out_bf16, ref, atol=1e-1, rtol=1e-1), "bf16 mismatch vs reference"

    print("KERNEL_OK")
</pallas_src>

<mosaic_0001>
module attributes {stable_mosaic.version = 11 : i64} {
  func.func @autoencoder_kernel(%arg0: i32, %arg1: memref<16x8xf32, #tpu.memory_space<vmem>>, %arg2: memref<32x16xf32, #tpu.memory_space<vmem>>, %arg3: memref<32x1xf32, #tpu.memory_space<vmem>>, %arg4: memref<8x32xf32, #tpu.memory_space<vmem>>, %arg5: memref<8x1xf32, #tpu.memory_space<vmem>>, %arg6: memref<32x8xf32, #tpu.memory_space<vmem>>, %arg7: memref<32x1xf32, #tpu.memory_space<vmem>>, %arg8: memref<16x32xf32, #tpu.memory_space<vmem>>, %arg9: memref<16x1xf32, #tpu.memory_space<vmem>>, %arg10: memref<16x8xf32, #tpu.memory_space<vmem>>) attributes {dimension_semantics = [#tpu.dimension_semantics<parallel>], iteration_bounds = array<i64: 1>, scalar_prefetch = 0 : i64, scratch_operands = 0 : i64, tpu.core_type = #tpu.core_type<tc>, window_params = [{transform_indices = @transform_0, window_bounds = array<i64: 16, 8>}, {pipeline_mode = #tpu.pipeline_mode<synchronous>, transform_indices = @transform_1, window_bounds = array<i64: 32, 16>}, {pipeline_mode = #tpu.pipeline_mode<synchronous>, transform_indices = @transform_2, window_bounds = array<i64: 32, 1>}, {pipeline_mode = #tpu.pipeline_mode<synchronous>, transform_indices = @transform_3, window_bounds = array<i64: 8, 32>}, {pipeline_mode = #tpu.pipeline_mode<synchronous>, transform_indices = @transform_4, window_bounds = array<i64: 8, 1>}, {pipeline_mode = #tpu.pipeline_mode<synchronous>, transform_indices = @transform_5, window_bounds = array<i64: 32, 8>}, {pipeline_mode = #tpu.pipeline_mode<synchronous>, transform_indices = @transform_6, window_bounds = array<i64: 32, 1>}, {pipeline_mode = #tpu.pipeline_mode<synchronous>, transform_indices = @transform_7, window_bounds = array<i64: 16, 32>}, {pipeline_mode = #tpu.pipeline_mode<synchronous>, transform_indices = @transform_8, window_bounds = array<i64: 16, 1>}, {transform_indices = @transform_9, window_bounds = array<i64: 16, 8>}]} {
    %c0 = arith.constant 0 : index
    %c0_0 = arith.constant 0 : index
    %0 = vector.load %arg1[%c0, %c0_0] : memref<16x8xf32, #tpu.memory_space<vmem>>, vector<16x8xf32>
    %c0_1 = arith.constant 0 : index
    %c0_2 = arith.constant 0 : index
    %1 = vector.load %arg2[%c0_1, %c0_2] : memref<32x16xf32, #tpu.memory_space<vmem>>, vector<32x16xf32>
    %cst = arith.constant dense<0.000000e+00> : vector<32x8xf32>
    %2 = tpu.matmul %1, %0, %cst {dimension_numbers = #tpu.dot_dimension_numbers<[1], [0], [0], [1], [0, 0, 1, 1], [], []>} : vector<32x16xf32>, vector<16x8xf32>, vector<32x8xf32> -> vector<32x8xf32>
    %c0_3 = arith.constant 0 : index
    %c0_4 = arith.constant 0 : index
    %3 = vector.load %arg3[%c0_3, %c0_4] : memref<32x1xf32, #tpu.memory_space<vmem>>, vector<32x1xf32>
    %4 = vector.broadcast %3 : vector<32x1xf32> to vector<32x8xf32>
    %5 = arith.addf %2, %4 : vector<32x8xf32>
    %cst_5 = arith.constant 0.000000e+00 : f32
    %6 = vector.broadcast %cst_5 : f32 to vector<32x8xf32>
    %7 = arith.maximumf %5, %6 : vector<32x8xf32>
    %c0_6 = arith.constant 0 : index
    %c0_7 = arith.constant 0 : index
    %8 = vector.load %arg4[%c0_6, %c0_7] : memref<8x32xf32, #tpu.memory_space<vmem>>, vector<8x32xf32>
    %cst_8 = arith.constant dense<0.000000e+00> : vector<8x8xf32>
    %9 = tpu.matmul %8, %7, %cst_8 {dimension_numbers = #tpu.dot_dimension_numbers<[1], [0], [0], [1], [0, 0, 1, 1], [], []>} : vector<8x32xf32>, vector<32x8xf32>, vector<8x8xf32> -> vector<8x8xf32>
    %c0_9 = arith.constant 0 : index
    %c0_10 = arith.constant 0 : index
    %10 = vector.load %arg5[%c0_9, %c0_10] : memref<8x1xf32, #tpu.memory_space<vmem>>, vector<8x1xf32>
    %11 = vector.broadcast %10 : vector<8x1xf32> to vector<8x8xf32>
    %12 = arith.addf %9, %11 : vector<8x8xf32>
    %cst_11 = arith.constant 0.000000e+00 : f32
    %13 = vector.broadcast %cst_11 : f32 to vector<8x8xf32>
    %14 = arith.maximumf %12, %13 : vector<8x8xf32>
    %c0_12 = arith.constant 0 : index
    %c0_13 = arith.constant 0 : index
    %15 = vector.load %arg6[%c0_12, %c0_13] : memref<32x8xf32, #tpu.memory_space<vmem>>, vector<32x8xf32>
    %cst_14 = arith.constant dense<0.000000e+00> : vector<32x8xf32>
    %16 = tpu.matmul %15, %14, %cst_14 {dimension_numbers = #tpu.dot_dimension_numbers<[1], [0], [0], [1], [0, 0, 1, 1], [], []>} : vector<32x8xf32>, vector<8x8xf32>, vector<32x8xf32> -> vector<32x8xf32>
    %c0_15 = arith.constant 0 : index
    %c0_16 = arith.constant 0 : index
    %17 = vector.load %arg7[%c0_15, %c0_16] : memref<32x1xf32, #tpu.memory_space<vmem>>, vector<32x1xf32>
    %18 = vector.broadcast %17 : vector<32x1xf32> to vector<32x8xf32>
    %19 = arith.addf %16, %18 : vector<32x8xf32>
    %cst_17 = arith.constant 0.000000e+00 : f32
    %20 = vector.broadcast %cst_17 : f32 to vector<32x8xf32>
    %21 = arith.maximumf %19, %20 : vector<32x8xf32>
    %c0_18 = arith.constant 0 : index
    %c0_19 = arith.constant 0 : index
    %22 = vector.load %arg8[%c0_18, %c0_19] : memref<16x32xf32, #tpu.memory_space<vmem>>, vector<16x32xf32>
    %cst_20 = arith.constant dense<0.000000e+00> : vector<16x8xf32>
    %23 = tpu.matmul %22, %21, %cst_20 {dimension_numbers = #tpu.dot_dimension_numbers<[1], [0], [0], [1], [0, 0, 1, 1], [], []>} : vector<16x32xf32>, vector<32x8xf32>, vector<16x8xf32> -> vector<16x8xf32>
    %c0_21 = arith.constant 0 : index
    %c0_22 = arith.constant 0 : index
    %24 = vector.load %arg9[%c0_21, %c0_22] : memref<16x1xf32, #tpu.memory_space<vmem>>, vector<16x1xf32>
    %25 = vector.broadcast %24 : vector<16x1xf32> to vector<16x8xf32>
    %26 = arith.addf %23, %25 : vector<16x8xf32>
    %c0_23 = arith.constant 0 : index
    %c0_24 = arith.constant 0 : index
    %27 = vector.load %arg10[%c0_23, %c0_24] : memref<16x8xf32, #tpu.memory_space<vmem>>, vector<16x8xf32>
    tpu.vector_store %arg10[%c0_23, %c0_24], %26 {strides = array<i32>} : memref<16x8xf32, #tpu.memory_space<vmem>>, vector<16x8xf32>,
    return
  }
  func.func @transform_0(%arg0: i32) -> (i32, i32) {
    %c0_i32 = arith.constant 0 : i32
    %c0_i32_0 = arith.constant 0 : i32
    return %c0_i32, %arg0 : i32, i32
  }
  func.func @transform_1(%arg0: i32) -> (i32, i32) {
    %c0_i32 = arith.constant 0 : i32
    %c0_i32_0 = arith.constant 0 : i32
    %c0_i32_1 = arith.constant 0 : i32
    return %c0_i32, %c0_i32_0 : i32, i32
  }
  func.func @transform_2(%arg0: i32) -> (i32, i32) {
    %c0_i32 = arith.constant 0 : i32
    %c0_i32_0 = arith.constant 0 : i32
    %c0_i32_1 = arith.constant 0 : i32
    return %c0_i32, %c0_i32_0 : i32, i32
  }
  func.func @transform_3(%arg0: i32) -> (i32, i32) {
    %c0_i32 = arith.constant 0 : i32
    %c0_i32_0 = arith.constant 0 : i32
    %c0_i32_1 = arith.constant 0 : i32
    return %c0_i32, %c0_i32_0 : i32, i32
  }
  func.func @transform_4(%arg0: i32) -> (i32, i32) {
    %c0_i32 = arith.constant 0 : i32
    %c0_i32_0 = arith.constant 0 : i32
    %c0_i32_1 = arith.constant 0 : i32
    return %c0_i32, %c0_i32_0 : i32, i32
  }
  func.func @transform_5(%arg0: i32) -> (i32, i32) {
    %c0_i32 = arith.constant 0 : i32
    %c0_i32_0 = arith.constant 0 : i32
    %c0_i32_1 = arith.constant 0 : i32
    return %c0_i32, %c0_i32_0 : i32, i32
  }
  func.func @transform_6(%arg0: i32) -> (i32, i32) {
    %c0_i32 = arith.constant 0 : i32
    %c0_i32_0 = arith.constant 0 : i32
    %c0_i32_1 = arith.constant 0 : i32
    return %c0_i32, %c0_i32_0 : i32, i32
  }
  func.func @transform_7(%arg0: i32) -> (i32, i32) {
    %c0_i32 = arith.constant 0 : i32
    %c0_i32_0 = arith.constant 0 : i32
    %c0_i32_1 = arith.constant 0 : i32
    return %c0_i32, %c0_i32_0 : i32, i32
  }
  func.func @transform_8(%arg0: i32) -> (i32, i32) {
    %c0_i32 = arith.constant 0 : i32
    %c0_i32_0 = arith.constant 0 : i32
    %c0_i32_1 = arith.constant 0 : i32
    return %c0_i32, %c0_i32_0 : i32, i32
  }
  func.func @transform_9(%arg0: i32) -> (i32, i32) {
    %c0_i32 = arith.constant 0 : i32
    %c0_i32_0 = arith.constant 0 : i32
    return %c0_i32, %arg0 : i32, i32
  }
}

</mosaic_0001>

<bundles_post_ra>
// kernel: autoencoder_forward.1
= control target key start
LH: loop header
LB: loop body
LE: loop exit
PB: predicated region body
PF: predicated region fallthrough
CT: control target
= control target key end

     0   :  { %vm62_vm0 = vcmask 130048   ;;  %v574_v3 = vmov 0   ;;  %v575_v19 = vmov 0.0|0.0   ;;  %vm576_vm1 = vmmov 0   ;;  %s719_s0 = inlined_call_operand.vmem [shape: f32[16,8], index: 0, kind: input, shape index: {}]   ;;  %s720_s1 = inlined_call_operand.vmem [shape: f32[32,16], index: 1, kind: input, shape index: {}]   ;;  %s721_s2 = inlined_call_operand.vmem [shape: f32[32,1], index: 2, kind: input, shape index: {}]   ;;  %s722_s4 = inlined_call_operand.vmem [shape: f32[8,1], index: 4, kind: input, shape index: {}]   ;;  %s723_s6 = inlined_call_operand.vmem [shape: f32[32,1], index: 6, kind: input, shape index: {}]   ;;  %s724_s8 = inlined_call_operand.vmem [shape: f32[16,1], index: 8, kind: input, shape index: {}]   ;;  %s725_s3 = inlined_call_operand.vmem [shape: f32[8,32], index: 3, kind: input, shape index: {}]   ;;  %s726_s5 = inlined_call_operand.vmem [shape: f32[32,8], index: 5, kind: input, shape index: {}]   ;;  %s727_s7 = inlined_call_operand.vmem [shape: f32[16,32], index: 7, kind: input, shape index: {}]   ;;  %s728_s9 = inlined_call_operand.vmem [shape: f32[16,8], index: 9, kind: output, shape index: {}]  }
   0x1   :  { %v32_v0 = vld [vmem:[%s719_s0] sm:$0xff]  ;;  %v33_v1 = vld [vmem:[%s719_s0 + $0x8] sm:$0xff]  ;;  %572 = vset.pattern.permute.xlu0 %v574_v3  ;;  %573 = vset.pattern.permute.xlu1 %v574_v3  ;;  %v40_v6 = vld [vmem:[%s721_s2 + $0x10] sm:$0xff]  ;;  %v577_v20 = vmov 0.0   ;;  %vm171_vm2 = vcmask 261120   ;;  %vm274_vm3 = vcmask 64512  }
   0x2   :  { %v34_v2 = vld [vmem:[%s720_s1] sm:$0xff]  ;;  %v550_v4 = vpack.c.bf16 %v33_v1, %v32_v0  ;;  %v35_v7 = vld [vmem:[%s720_s1 + $0x8] sm:$0xff]  ;;  %54 = vperm.xlu1 %573, %v40_v6   ;;  %v36_v9 = vld [vmem:[%s720_s1 + $0x10] sm:$0xff]  ;;  %554 = vmatprep.subr.bf16.mxu1 %v575_v19 }
   0x3   :  { %514 = vmatprep.mubr.msk.f32.mxu0 %vm62_vm0, %v34_v2  ;;  %v38_v5 = vld [vmem:[%s721_s2] sm:$0xff]  ;;  %v39_v8 = vld [vmem:[%s721_s2 + $0x8] sm:$0xff]  ;;  %v41_v10 = vld [vmem:[%s721_s2 + $0x18] sm:$0xff]  ;;  %528 = vmatprep.mubr.msk.f32.mxu1 %vm576_vm1, %v577_v20 }
   0x4   :  { %551 = vmatprep.subr.bf16.mxu0 %v550_v4  ;;  %44 = vperm.xlu0 %572, %v38_v5   ;;  %v37_v11 = vld [vmem:[%s720_s1 + $0x18] sm:$0xff]  ;;  %v165_v12 = vld [vmem:[%s722_s4] sm:$0xff]  ;;  %v251_v14 = vld [vmem:[%s723_s6 + $0x8] sm:$0xff] }
   0x5   :  { %553 = vmatpush3.bf16.msra.mxu0 %v550_v4  ;;  %v250_v13 = vld [vmem:[%s723_s6] sm:$0xff]  ;;  %v252_v15 = vld [vmem:[%s723_s6 + $0x10] sm:$0xff]  ;;  %v253_v16 = vld [vmem:[%s723_s6 + $0x18] sm:$0xff] }
   0x6   :  { %59 = vperm.xlu1 %573, %v41_v10   ;;  %v378_v17 = vld [vmem:[%s724_s8] sm:$0xff]  ;;  %v379_v18 = vld [vmem:[%s724_s8 + $0x8] sm:$0xff]  ;;  %v248_v47 = vld [vmem:[%s726_s5 + $0x10] sm:$0xff] }
   0x7   :  { %v164_v39 = vld [vmem:[%s725_s3] sm:$0xff]  ;;  %v247_v46 = vld [vmem:[%s726_s5 + $0x8] sm:$0xff]  ;;  %v249_v48 = vld [vmem:[%s726_s5 + $0x18] sm:$0xff] }
   0x8   :  { %515 = vmatmul.mubr.msk.f32.vlgmr.msra.gmra.mrb[0].mxu0 %vm62_vm0, %v35_v7  ;;  %49 = vperm.xlu0 %572, %v39_v8   ;;  %v246_v40 = vld [vmem:[%s726_s5] sm:$0xff]  ;;  %v377_v4 = vld [vmem:[%s727_s7 + $0x8] sm:$0xff] }
   0x9   :  { %517 = vmatprep.mubr.msk.f32.mxu0 %vm62_vm0, %v36_v9  ;;  %v376_v49 = vld [vmem:[%s727_s7] sm:$0xff] }
   0xa   :  { %256 = vperm.xlu1 %573, %v250_v13  }
   0xc   :  { %518 = vmatmul.mubr.msk.f32.gmra.mrb[2].mxu0 %vm62_vm0, %v37_v11  ;;  %168 = vperm.xlu0 %572, %v165_v12  }
   0xd   :  { %533 = vmatprep.mubr.msk.f32.mxu0 %vm274_vm3, %v246_v40 }
   0xe   :  { %266 = vperm.xlu1 %573, %v252_v15  }
  0x10   :  { %261 = vperm.xlu0 %572, %v251_v14  }
  0x12   :  { %382 = vperm.xlu1 %573, %v378_v17  }
  0x14   :  { %271 = vperm.xlu0 %572, %v253_v16  }
  0x18   :  { %387 = vperm.xlu0 %572, %v379_v18  }
  0x81   :  { %v55_v22 = vpop.permute.xlu1 %54 }
  0x83   :  { %v45_v21 = vpop.permute.xlu0 %44 }
  0x85   :  { %v60_v29 = vpop.permute.xlu1 %59 }
  0x87   :  { %v50_v23 = vpop.permute.xlu0 %49 }
  0x89   :  { %v257_v51 = vpop.permute.xlu1 %256 }
  0x8b   :  { %v169_v41 = vpop.permute.xlu0 %168 }
  0x8d   :  { %v267_v60 = vpop.permute.xlu1 %266 }
  0x8f   :  { %v262_v50 = vpop.permute.xlu0 %261 }
  0x91   :  { %v383_v7 = vpop.permute.xlu1 %382 }
  0x93   :  { %v272_v57 = vpop.permute.xlu0 %271 }
  0x97   :  { %v388_v5 = vpop.permute.xlu0 %387 }
  0xdb   :  { %v516_v24 = vpop.f32.mrb[0].mxu0 }
  0xdc   :  { %v147_v25 = vadd.f32 %v516_v24, %v50_v23  ;;  %v141_v26 = vpop.f32.mrb[1].mxu0 }
  0xdd   :  { %v142_v27 = vadd.f32 %v141_v26, %v45_v21 }
  0xde   :  { %v161_v28 = vmax.f32 %v147_v25, 0.0 }
  0xdf   :  { %v160_v30 = vmax.f32 %v142_v27, 0.0  ;;  %v519_v31 = vpop.f32.mrb[2].mxu0 }
  0xe0   :  { %v157_v32 = vadd.f32 %v519_v31, %v60_v29  ;;  %v151_v33 = vpop.f32.mrb[3].mxu0 }
  0xe1   :  { %v152_v34 = vadd.f32 %v151_v33, %v55_v22  ;;  %v555_v35 = vpack.c.bf16 %v161_v28, %v160_v30 }
  0xe2   :  { %v163_v36 = vmax.f32 %v157_v32, 0.0 }
  0xe3   :  { %v162_v37 = vmax.f32 %v152_v34, 0.0  ;;  %556 = vmatpush3.bf16.msra.mxu1 %v555_v35 }
  0xe4   :  { %557 = vmatprep.subr.bf16.mxu1 %v575_v19 }
  0xe5   :  { %v558_v38 = vpack.c.bf16 %v163_v36, %v162_v37 }
  0xe7   :  { %559 = vmatpush3.bf16.msra.mxu1 %v558_v38 }
  0xea   :  { %529 = vmatmul.mubr.msk.f32.vlgmr.msra.gmra.mrb[0].mxu1 %vm171_vm2, %v164_v39 }
  0xeb   :  { %547 = vmatprep.mubr.msk.f32.mxu1 %vm171_vm2, %v376_v49 }
 0x1bd   :  { %v241_v42 = vpop.f32.mrb[0].mxu1 }
 0x1be   :  { %v242_v43 = vadd.f32 %v241_v42, %v169_v41  ;;  %v530_v44 = vpop.f32.mrb[1].mxu1 }
 0x1c0   :  { %v245_v45 = vmax.f32 %v242_v43, 0.0 }
 0x1c2   :  { %531 = vmatprep.subr.mxu0 %v245_v45 }
 0x1c3   :  { %532 = vmatpush3.msra.mxu0 %v245_v45 }
 0x1c4   :  { %534 = vmatmul.mubr.msk.f32.vlgmr.msra.gmra.mrb[4].mxu0 %vm274_vm3, %v247_v46 }
 0x1c5   :  { %536 = vmatprep.mubr.msk.f32.mxu0 %vm274_vm3, %v248_v47 }
 0x1c8   :  { %537 = vmatmul.mubr.msk.f32.gmra.mrb[6].mxu0 %vm274_vm3, %v249_v48 }
 0x297   :  { %v535_v52 = vpop.f32.mrb[4].mxu0 }
 0x298   :  { %v359_v53 = vadd.f32 %v535_v52, %v262_v50  ;;  %v353_v54 = vpop.f32.mrb[5].mxu0 }
 0x299   :  { %v354_v55 = vadd.f32 %v353_v54, %v257_v51 }
 0x29a   :  { %v373_v56 = vmax.f32 %v359_v53, 0.0 }
 0x29b   :  { %v372_v58 = vmax.f32 %v354_v55, 0.0  ;;  %v538_v59 = vpop.f32.mrb[6].mxu0 }
 0x29c   :  { %v369_v61 = vadd.f32 %v538_v59, %v272_v57  ;;  %v363_v62 = vpop.f32.mrb[7].mxu0 }
 0x29d   :  { %v560_v63 = vpack.c.bf16 %v373_v56, %v372_v58  ;;  %v364_v0 = vadd.f32 %v363_v62, %v267_v60 }
 0x29e   :  { %v375_v1 = vmax.f32 %v369_v61, 0.0 }
 0x29f   :  { %v374_v2 = vmax.f32 %v364_v0, 0.0  ;;  %561 = vmatprep.subr.bf16.mxu1 %v560_v63 }
 0x2a0   :  { %563 = vmatpush3.bf16.msra.mxu1 %v560_v63 }
 0x2a1   :  { %v564_v3 = vpack.c.bf16 %v375_v1, %v374_v2 }
 0x2a3   :  { %565 = vmatprep.subr.bf16.mxu1 %v564_v3 }
 0x2a4   :  { %567 = vmatpush3.bf16.msra.mxu1 %v564_v3 }
 0x2a7   :  { %548 = vmatmul.mubr.msk.f32.vlgmr.msra.gmra.mrb[2].mxu1 %vm171_vm2, %v377_v4 }
 0x37a   :  { %v549_v6 = vpop.f32.mrb[2].mxu1 }
 0x37b   :  { %v468_v8 = vadd.f32 %v549_v6, %v388_v5  ;;  %v462_v9 = vpop.f32.mrb[3].mxu1 }
 0x37c   :  { %v463_v10 = vadd.f32 %v462_v9, %v383_v7 }
 0x37d   :  { %472 = vst.msk [vmem:[%s728_s9 + $0x8] sm:$0xff] %vm274_vm3, %v468_v8 }
 0x37e   :  { %471 = vst.msk [vmem:[%s728_s9] sm:$0xff] %vm274_vm3, %v463_v10 }

</bundles_post_ra>
